<compile_context>
chip_gen: v7x
topology: tpu7x:2x2x1
jax: 0.10.0
libtpu: 0.0.40
codegen_flags: <defaults>
</compile_context>

<pallas_src>
import functools

import jax
import jax.numpy as jnp
import numpy as np
from jax.experimental import pallas as pl
from jax.experimental.pallas import tpu as pltpu


# ----------------------------- Pallas kernel ------------------------------ #
def _encoder_lstm_kernel(x_ref, *refs, nlayers, seq_len, batch_p, hidden):
    """Fused multi-layer LSTM forward; single grid step, everything in VMEM.

    x_ref : (T*Bp, F)  time-major flattened (row index = t*Bp + b), batch padded
    per layer l: W_ih^T (Fin,4H), W_hh^T (H,4H), bias (1,4H)   (VMEM resident)
    outputs: out (T*Bp, H), hn (L,Bp,H), cn (L,Bp,H)
    scratch: gates_ref (T*Bp,4H) f32, act_ref (T*Bp,H) f32
    """
    w_refs = refs[:3 * nlayers]
    out_ref, hn_ref, cn_ref, gates_ref, act_ref = refs[3 * nlayers:]

    Bp, H, T = batch_p, hidden, seq_len

    for l in range(nlayers):
        wih = w_refs[3 * l + 0][...]        # (Fin, 4H)
        whh = w_refs[3 * l + 1][...]        # (H, 4H)  hoisted, resident
        bias = w_refs[3 * l + 2][...]       # (1, 4H)

        # ---- input projection for the whole sequence: one big MXU matmul,
        # ---- hoisted out of the serial recurrence, result parked in VMEM.
        src = x_ref[...] if l == 0 else act_ref[...]          # (T*Bp, Fin)
        gates_ref[...] = (jnp.dot(src, wih,
                                  preferred_element_type=jnp.float32)
                          + bias)                              # (T*Bp, 4H)

        # ---- serial recurrence: only h @ W_hh^T on the critical path.
        def step(t, carry):
            h, c = carry
            row = pl.multiple_of(t * Bp, 8)                    # aligned start
            g = gates_ref[pl.ds(row, Bp), :] + jnp.dot(
                h, whh, preferred_element_type=jnp.float32)    # (Bp, 4H)

            # two full-width (4H-lane) activations instead of four quarters
            sg = jax.nn.sigmoid(g)
            th = jnp.tanh(g)
            i_g = sg[:, 0 * H:1 * H]
            f_g = sg[:, 1 * H:2 * H]
            o_g = sg[:, 3 * H:4 * H]
            g_g = th[:, 2 * H:3 * H]

            c = f_g * c + i_g * g_g
            h = o_g * jnp.tanh(c)
            act_ref[pl.ds(row, Bp), :] = h                     # aligned store
            return (h, c)

        h0 = jnp.zeros((Bp, H), jnp.float32)
        c0 = jnp.zeros((Bp, H), jnp.float32)
        h, c = jax.lax.fori_loop(0, T, step, (h0, c0))

        # final states written once per layer (not every timestep)
        hn_ref[l] = h.astype(hn_ref.dtype)
        cn_ref[l] = c.astype(cn_ref.dtype)

    # single lane-dense slab store of the last layer's activations
    out_ref[...] = act_ref[...].astype(out_ref.dtype)


def encoder_lstm_pallas(x, params):
    """Run the full nlayers LSTM stack in one fused Pallas kernel.

    x      : (B, T, F) batch-first input
    params : list over layers of (w_ih (4H,Fin), w_hh (4H,H), b_ih, b_hh)
    returns (output (B,T,H), h_n (L,B,H), c_n (L,B,H))
    """
    B, T, F = x.shape
    H = params[0][1].shape[1]
    L = len(params)

    # pad batch to a multiple of 8 so each timestep occupies whole sublane
    # groups (per-step slices/stores are tile-aligned, full VPU occupancy)
    Bp = ((B + 7) // 8) * 8
    if Bp != B:
        x_p = jnp.concatenate(
            [x, jnp.zeros((Bp - B, T, F), x.dtype)], axis=0)
    else:
        x_p = x

    # time-major, flattened to 2-D so every in-kernel matmul / slice is 2-D
    x_tb = jnp.transpose(x_p, (1, 0, 2)).reshape(T * Bp, F)

    weight_args = []
    in_specs = [pl.BlockSpec((T * Bp, F), lambda i: (0, 0))]
    for (w_ih, w_hh, b_ih, b_hh) in params:
        wih_t = jnp.transpose(w_ih).astype(jnp.float32)     # (Fin, 4H)
        whh_t = jnp.transpose(w_hh).astype(jnp.float32)     # (H, 4H)
        bias = (b_ih + b_hh).reshape(1, 4 * H).astype(jnp.float32)
        weight_args += [wih_t, whh_t, bias]
        in_specs += [
            pl.BlockSpec(wih_t.shape, lambda i: (0, 0)),
            pl.BlockSpec(whh_t.shape, lambda i: (0, 0)),
            pl.BlockSpec(bias.shape, lambda i: (0, 0)),
        ]

    kernel = functools.partial(_encoder_lstm_kernel, nlayers=L,
                               seq_len=T, batch_p=Bp, hidden=H)

    out2d, hn, cn = pl.pallas_call(
        kernel,
        out_shape=(jax.ShapeDtypeStruct((T * Bp, H), x.dtype),
                   jax.ShapeDtypeStruct((L, Bp, H), x.dtype),
                   jax.ShapeDtypeStruct((L, Bp, H), x.dtype)),
        grid=(1,),
        in_specs=in_specs,
        out_specs=(pl.BlockSpec((T * Bp, H), lambda i: (0, 0)),
                   pl.BlockSpec((L, Bp, H), lambda i: (0, 0, 0)),
                   pl.BlockSpec((L, Bp, H), lambda i: (0, 0, 0))),
        scratch_shapes=[pltpu.VMEM((T * Bp, 4 * H), jnp.float32),   # gates_x
                        pltpu.VMEM((T * Bp, H), jnp.float32)],      # act slab
        compiler_params=pltpu.CompilerParams(
            dimension_semantics=("arbitrary",),       # recurrence -> sequential
            vmem_limit_bytes=32 * 1024 * 1024),
    )(x_tb, *weight_args)

    # drop batch padding, back to (B, T, H)
    output = jnp.transpose(out2d.reshape(T, Bp, H)[:, :B, :], (1, 0, 2))
    return output, hn[:, :B, :], cn[:, :B, :]


# --------------------------- EncoderRNN forward ---------------------------- #
def encoder_rnn_forward(x, params):
    """Mirrors EncoderRNN.forward semantics (inference)."""
    B = x.shape[0]
    output, hn, cn = encoder_lstm_pallas(x, params)
    # TODO(synk): inter-layer dropout (training-mode only) not applied; dropout=0.0 here.

    # output = torch.flip(output, [1])
    output = jnp.flip(output, axis=1)
    # newinput = cat(zeros, flip(x, [1]))[:, :-1, :]
    zeros = jnp.zeros((B, 1, x.shape[-1]), dtype=x.dtype)
    newinput = jnp.concatenate([zeros, jnp.flip(x, axis=1)], axis=1)[:, :-1, :]
    return output, (hn, cn), newinput


# ------------------------ pure-JAX reference (check) ----------------------- #
def _lstm_layer_ref(x_tbf, w_ih, w_hh, b_ih, b_hh):
    H = w_hh.shape[1]
    B = x_tbf.shape[1]

    def step(carry, x_t):
        h, c = carry
        gates = x_t @ w_ih.T + h @ w_hh.T + b_ih + b_hh
        i = jax.nn.sigmoid(gates[:, 0 * H:1 * H])
        f = jax.nn.sigmoid(gates[:, 1 * H:2 * H])
        g = jnp.tanh(gates[:, 2 * H:3 * H])
        o = jax.nn.sigmoid(gates[:, 3 * H:4 * H])
        c = f * c + i * g
        h = o * jnp.tanh(c)
        return (h, c), h

    init = (jnp.zeros((B, H), x_tbf.dtype), jnp.zeros((B, H), x_tbf.dtype))
    (hn, cn), out = jax.lax.scan(step, init, x_tbf)
    return out, hn, cn


# ----------------------------------- main ---------------------------------- #
def init_params(key, input_size, nhidden, nlayers):
    """PyTorch LSTM parameter shapes, uniform(-0.1, 0.1) like init_weights()."""
    params = []
    for layer in range(nlayers):
        f_in = input_size if layer == 0 else nhidden
        key, k1, k2, k3, k4 = jax.random.split(key, 5)
        w_ih = jax.random.uniform(k1, (4 * nhidden, f_in), jnp.float32, -0.1, 0.1)
        w_hh = jax.random.uniform(k2, (4 * nhidden, nhidden), jnp.float32, -0.1, 0.1)
        b_ih = jax.random.uniform(k3, (4 * nhidden,), jnp.float32, -0.1, 0.1)
        b_hh = jax.random.uniform(k4, (4 * nhidden,), jnp.float32, -0.1, 0.1)
        params.append((w_ih, w_hh, b_ih, b_hh))
    return params


if __name__ == "__main__":
    input_size = 16   # feasize
    nhidden = 32
    nlayers = 2
    B, T = 2, 8

    key = jax.random.PRNGKey(0)
    key, kx = jax.random.split(key)
    x = jax.random.normal(kx, (B, T, input_size), jnp.float32)
    params = init_params(key, input_size, nhidden, nlayers)

    output, (hn, cn), newinput = encoder_rnn_forward(x, params)
    jax.block_until_ready((output, hn, cn, newinput))

    # correctness check against a pure-JAX LSTM reference
    h_ref = jnp.transpose(x, (1, 0, 2))
    hns_r, cns_r = [], []
    for p in params:
        h_ref, hn_r, cn_r = _lstm_layer_ref(h_ref, *p)
        hns_r.append(hn_r)
        cns_r.append(cn_r)
    out_ref = jnp.flip(jnp.transpose(h_ref, (1, 0, 2)), axis=1)
    hn_ref = jnp.stack(hns_r, 0)
    cn_ref = jnp.stack(cns_r, 0)
    newinput_ref = jnp.concatenate(
        [jnp.zeros((B, 1, input_size), x.dtype), jnp.flip(x, axis=1)], axis=1)[:, :-1, :]

    np.testing.assert_allclose(np.asarray(output), np.asarray(out_ref), rtol=1e-5, atol=1e-5)
    np.testing.assert_allclose(np.asarray(hn), np.asarray(hn_ref), rtol=1e-5, atol=1e-5)
    np.testing.assert_allclose(np.asarray(cn), np.asarray(cn_ref), rtol=1e-5, atol=1e-5)
    np.testing.assert_allclose(np.asarray(newinput), np.asarray(newinput_ref), rtol=1e-6, atol=1e-6)

    print("KERNEL_OK")
</pallas_src>

<mosaic_0001>
module attributes {stable_mosaic.version = 11 : i64} {
  func.func @_encoder_lstm_kernel(%arg0: i32, %arg1: memref<64x16xf32, #tpu.memory_space<vmem>>, %arg2: memref<16x128xf32, #tpu.memory_space<vmem>>, %arg3: memref<32x128xf32, #tpu.memory_space<vmem>>, %arg4: memref<1x128xf32, #tpu.memory_space<vmem>>, %arg5: memref<32x128xf32, #tpu.memory_space<vmem>>, %arg6: memref<32x128xf32, #tpu.memory_space<vmem>>, %arg7: memref<1x128xf32, #tpu.memory_space<vmem>>, %arg8: memref<64x32xf32, #tpu.memory_space<vmem>>, %arg9: memref<2x8x32xf32, #tpu.memory_space<vmem>>, %arg10: memref<2x8x32xf32, #tpu.memory_space<vmem>>, %arg11: memref<64x128xf32, #tpu.memory_space<vmem>>, %arg12: memref<64x32xf32, #tpu.memory_space<vmem>>) attributes {dimension_semantics = [#tpu.dimension_semantics<arbitrary>], iteration_bounds = array<i64: 1>, scalar_prefetch = 0 : i64, scratch_operands = 2 : i64, tpu.core_type = #tpu.core_type<tc>, window_params = [{pipeline_mode = #tpu.pipeline_mode<synchronous>, transform_indices = @transform_0, window_bounds = array<i64: 64, 16>}, {pipeline_mode = #tpu.pipeline_mode<synchronous>, transform_indices = @transform_1, window_bounds = array<i64: 16, 128>}, {pipeline_mode = #tpu.pipeline_mode<synchronous>, transform_indices = @transform_2, window_bounds = array<i64: 32, 128>}, {pipeline_mode = #tpu.pipeline_mode<synchronous>, transform_indices = @transform_3, window_bounds = array<i64: 1, 128>}, {pipeline_mode = #tpu.pipeline_mode<synchronous>, transform_indices = @transform_4, window_bounds = array<i64: 32, 128>}, {pipeline_mode = #tpu.pipeline_mode<synchronous>, transform_indices = @transform_5, window_bounds = array<i64: 32, 128>}, {pipeline_mode = #tpu.pipeline_mode<synchronous>, transform_indices = @transform_6, window_bounds = array<i64: 1, 128>}, {pipeline_mode = #tpu.pipeline_mode<synchronous>, transform_indices = @transform_7, window_bounds = array<i64: 64, 32>}, {pipeline_mode = #tpu.pipeline_mode<synchronous>, transform_indices = @transform_8, window_bounds = array<i64: 2, 8, 32>}, {pipeline_mode = #tpu.pipeline_mode<synchronous>, transform_indices = @transform_9, window_bounds = array<i64: 2, 8, 32>}]} {
    %c0 = arith.constant 0 : index
    %c0_0 = arith.constant 0 : index
    %0 = vector.load %arg2[%c0, %c0_0] : memref<16x128xf32, #tpu.memory_space<vmem>>, vector<16x128xf32>
    %c0_1 = arith.constant 0 : index
    %c0_2 = arith.constant 0 : index
    %1 = vector.load %arg3[%c0_1, %c0_2] : memref<32x128xf32, #tpu.memory_space<vmem>>, vector<32x128xf32>
    %c0_3 = arith.constant 0 : index
    %c0_4 = arith.constant 0 : index
    %2 = vector.load %arg4[%c0_3, %c0_4] : memref<1x128xf32, #tpu.memory_space<vmem>>, vector<1x128xf32>
    %c0_5 = arith.constant 0 : index
    %c0_6 = arith.constant 0 : index
    %3 = vector.load %arg1[%c0_5, %c0_6] : memref<64x16xf32, #tpu.memory_space<vmem>>, vector<64x16xf32>
    %cst = arith.constant dense<0.000000e+00> : vector<64x128xf32>
    %4 = tpu.matmul %3, %0, %cst {dimension_numbers = #tpu.dot_dimension_numbers<[1], [0], [0], [1], [0, 0, 1, 1], [], []>} : vector<64x16xf32>, vector<16x128xf32>, vector<64x128xf32> -> vector<64x128xf32>
    %5 = vector.broadcast %2 : vector<1x128xf32> to vector<64x128xf32>
    %6 = arith.addf %4, %5 : vector<64x128xf32>
    %c0_7 = arith.constant 0 : index
    %c0_8 = arith.constant 0 : index
    %7 = vector.load %arg11[%c0_7, %c0_8] : memref<64x128xf32, #tpu.memory_space<vmem>>, vector<64x128xf32>
    tpu.vector_store %arg11[%c0_7, %c0_8], %6 {strides = array<i32>} : memref<64x128xf32, #tpu.memory_space<vmem>>, vector<64x128xf32>,
    %cst_9 = arith.constant 0.000000e+00 : f32
    %8 = vector.broadcast %cst_9 : f32 to vector<8x32xf32>
    %cst_10 = arith.constant 0.000000e+00 : f32
    %9 = vector.broadcast %cst_10 : f32 to vector<8x32xf32>
    %c0_i32 = arith.constant 0 : i32
    %c8_i32 = arith.constant 8 : i32
    %10 = arith.addi %c0_i32, %c8_i32 : i32
    %c1_i32 = arith.constant 1 : i32
    %11:2 = scf.for %arg13 = %c0_i32 to %10 step %c1_i32 iter_args(%arg14 = %8, %arg15 = %9) -> (vector<8x32xf32>, vector<8x32xf32>)  : i32 {
      %c8_i32_44 = arith.constant 8 : i32
      %38 = arith.muli %arg13, %c8_i32_44 : i32
      %39 = tpu.assume_multiple %38, 8 : i32
      %40 = arith.index_cast %39 : i32 to index
      %c0_45 = arith.constant 0 : index
      %41 = vector.load %arg11[%40, %c0_45] : memref<64x128xf32, #tpu.memory_space<vmem>>, vector<8x128xf32>
      %cst_46 = arith.constant dense<0.000000e+00> : vector<8x128xf32>
      %42 = tpu.matmul %arg14, %1, %cst_46 {dimension_numbers = #tpu.dot_dimension_numbers<[1], [0], [0], [1], [0, 0, 1, 1], [], []>} : vector<8x32xf32>, vector<32x128xf32>, vector<8x128xf32> -> vector<8x128xf32>
      %43 = arith.addf %41, %42 : vector<8x128xf32>
      %44 = arith.negf %43 : vector<8x128xf32>
      %45 = math.exp %44 : vector<8x128xf32>
      %cst_47 = arith.constant 1.000000e+00 : f32
      %46 = vector.broadcast %cst_47 : f32 to vector<8x128xf32>
      %47 = arith.addf %46, %45 : vector<8x128xf32>
      %48 = arith.divf %46, %47 : vector<8x128xf32>
      %49 = math.tanh %43 : vector<8x128xf32>
      %50 = vector.extract_strided_slice %48 {offsets = [0, 0], sizes = [8, 32], strides = [1, 1]} : vector<8x128xf32> to vector<8x32xf32>
      %51 = vector.extract_strided_slice %48 {offsets = [0, 32], sizes = [8, 32], strides = [1, 1]} : vector<8x128xf32> to vector<8x32xf32>
      %52 = vector.extract_strided_slice %48 {offsets = [0, 96], sizes = [8, 32], strides = [1, 1]} : vector<8x128xf32> to vector<8x32xf32>
      %53 = vector.extract_strided_slice %49 {offsets = [0, 64], sizes = [8, 32], strides = [1, 1]} : vector<8x128xf32> to vector<8x32xf32>
      %54 = arith.mulf %51, %arg15 : vector<8x32xf32>
      %55 = arith.mulf %50, %53 : vector<8x32xf32>
      %56 = arith.addf %54, %55 : vector<8x32xf32>
      %57 = math.tanh %56 : vector<8x32xf32>
      %58 = arith.mulf %52, %57 : vector<8x32xf32>
      %59 = arith.index_cast %39 : i32 to index
      %c0_48 = arith.constant 0 : index
      %60 = vector.load %arg12[%59, %c0_48] : memref<64x32xf32, #tpu.memory_space<vmem>>, vector<8x32xf32>
      tpu.vector_store %arg12[%59, %c0_48], %58 {strides = array<i32>} : memref<64x32xf32, #tpu.memory_space<vmem>>, vector<8x32xf32>,
      scf.yield %58, %56 : vector<8x32xf32>, vector<8x32xf32>
    }
    %c8_i32_11 = arith.constant 8 : i32
    %c0_12 = arith.constant 0 : index
    %c0_13 = arith.constant 0 : index
    %c0_14 = arith.constant 0 : index
    %12 = vector.load %arg9[%c0_12, %c0_13, %c0_14] : memref<2x8x32xf32, #tpu.memory_space<vmem>>, vector<1x8x32xf32>
    %13 = vector.shape_cast %12 : vector<1x8x32xf32> to vector<8x32xf32>
    %14 = vector.shape_cast %11#0 : vector<8x32xf32> to vector<1x8x32xf32>
    tpu.vector_store %arg9[%c0_12, %c0_13, %c0_14], %14 {strides = array<i32>} : memref<2x8x32xf32, #tpu.memory_space<vmem>>, vector<1x8x32xf32>,
    %c0_15 = arith.constant 0 : index
    %c0_16 = arith.constant 0 : index
    %c0_17 = arith.constant 0 : index
    %15 = vector.load %arg10[%c0_15, %c0_16, %c0_17] : memref<2x8x32xf32, #tpu.memory_space<vmem>>, vector<1x8x32xf32>
    %16 = vector.shape_cast %15 : vector<1x8x32xf32> to vector<8x32xf32>
    %17 = vector.shape_cast %11#1 : vector<8x32xf32> to vector<1x8x32xf32>
    tpu.vector_store %arg10[%c0_15, %c0_16, %c0_17], %17 {strides = array<i32>} : memref<2x8x32xf32, #tpu.memory_space<vmem>>, vector<1x8x32xf32>,
    %c0_18 = arith.constant 0 : index
    %c0_19 = arith.constant 0 : index
    %18 = vector.load %arg5[%c0_18, %c0_19] : memref<32x128xf32, #tpu.memory_space<vmem>>, vector<32x128xf32>
    %c0_20 = arith.constant 0 : index
    %c0_21 = arith.constant 0 : index
    %19 = vector.load %arg6[%c0_20, %c0_21] : memref<32x128xf32, #tpu.memory_space<vmem>>, vector<32x128xf32>
    %c0_22 = arith.constant 0 : index
    %c0_23 = arith.constant 0 : index
    %20 = vector.load %arg7[%c0_22, %c0_23] : memref<1x128xf32, #tpu.memory_space<vmem>>, vector<1x128xf32>
    %c0_24 = arith.constant 0 : index
    %c0_25 = arith.constant 0 : index
    %21 = vector.load %arg12[%c0_24, %c0_25] : memref<64x32xf32, #tpu.memory_space<vmem>>, vector<64x32xf32>
    %cst_26 = arith.constant dense<0.000000e+00> : vector<64x128xf32>
    %22 = tpu.matmul %21, %18, %cst_26 {dimension_numbers = #tpu.dot_dimension_numbers<[1], [0], [0], [1], [0, 0, 1, 1], [], []>} : vector<64x32xf32>, vector<32x128xf32>, vector<64x128xf32> -> vector<64x128xf32>
    %23 = vector.broadcast %20 : vector<1x128xf32> to vector<64x128xf32>
    %24 = arith.addf %22, %23 : vector<64x128xf32>
    %c0_27 = arith.constant 0 : index
    %c0_28 = arith.constant 0 : index
    %25 = vector.load %arg11[%c0_27, %c0_28] : memref<64x128xf32, #tpu.memory_space<vmem>>, vector<64x128xf32>
    tpu.vector_store %arg11[%c0_27, %c0_28], %24 {strides = array<i32>} : memref<64x128xf32, #tpu.memory_space<vmem>>, vector<64x128xf32>,
    %cst_29 = arith.constant 0.000000e+00 : f32
    %26 = vector.broadcast %cst_29 : f32 to vector<8x32xf32>
    %cst_30 = arith.constant 0.000000e+00 : f32
    %27 = vector.broadcast %cst_30 : f32 to vector<8x32xf32>
    %c0_i32_31 = arith.constant 0 : i32
    %c8_i32_32 = arith.constant 8 : i32
    %28 = arith.addi %c0_i32_31, %c8_i32_32 : i32
    %c1_i32_33 = arith.constant 1 : i32
    %29:2 = scf.for %arg13 = %c0_i32_31 to %28 step %c1_i32_33 iter_args(%arg14 = %26, %arg15 = %27) -> (vector<8x32xf32>, vector<8x32xf32>)  : i32 {
      %c8_i32_44 = arith.constant 8 : i32
      %38 = arith.muli %arg13, %c8_i32_44 : i32
      %39 = tpu.assume_multiple %38, 8 : i32
      %40 = arith.index_cast %39 : i32 to index
      %c0_45 = arith.constant 0 : index
      %41 = vector.load %arg11[%40, %c0_45] : memref<64x128xf32, #tpu.memory_space<vmem>>, vector<8x128xf32>
      %cst_46 = arith.constant dense<0.000000e+00> : vector<8x128xf32>
      %42 = tpu.matmul %arg14, %19, %cst_46 {dimension_numbers = #tpu.dot_dimension_numbers<[1], [0], [0], [1], [0, 0, 1, 1], [], []>} : vector<8x32xf32>, vector<32x128xf32>, vector<8x128xf32> -> vector<8x128xf32>
      %43 = arith.addf %41, %42 : vector<8x128xf32>
      %44 = arith.negf %43 : vector<8x128xf32>
      %45 = math.exp %44 : vector<8x128xf32>
      %cst_47 = arith.constant 1.000000e+00 : f32
      %46 = vector.broadcast %cst_47 : f32 to vector<8x128xf32>
      %47 = arith.addf %46, %45 : vector<8x128xf32>
      %48 = arith.divf %46, %47 : vector<8x128xf32>
      %49 = math.tanh %43 : vector<8x128xf32>
      %50 = vector.extract_strided_slice %48 {offsets = [0, 0], sizes = [8, 32], strides = [1, 1]} : vector<8x128xf32> to vector<8x32xf32>
      %51 = vector.extract_strided_slice %48 {offsets = [0, 32], sizes = [8, 32], strides = [1, 1]} : vector<8x128xf32> to vector<8x32xf32>
      %52 = vector.extract_strided_slice %48 {offsets = [0, 96], sizes = [8, 32], strides = [1, 1]} : vector<8x128xf32> to vector<8x32xf32>
      %53 = vector.extract_strided_slice %49 {offsets = [0, 64], sizes = [8, 32], strides = [1, 1]} : vector<8x128xf32> to vector<8x32xf32>
      %54 = arith.mulf %51, %arg15 : vector<8x32xf32>
      %55 = arith.mulf %50, %53 : vector<8x32xf32>
      %56 = arith.addf %54, %55 : vector<8x32xf32>
      %57 = math.tanh %56 : vector<8x32xf32>
      %58 = arith.mulf %52, %57 : vector<8x32xf32>
      %59 = arith.index_cast %39 : i32 to index
      %c0_48 = arith.constant 0 : index
      %60 = vector.load %arg12[%59, %c0_48] : memref<64x32xf32, #tpu.memory_space<vmem>>, vector<8x32xf32>
      tpu.vector_store %arg12[%59, %c0_48], %58 {strides = array<i32>} : memref<64x32xf32, #tpu.memory_space<vmem>>, vector<8x32xf32>,
      scf.yield %58, %56 : vector<8x32xf32>, vector<8x32xf32>
    }
    %c8_i32_34 = arith.constant 8 : i32
    %c1 = arith.constant 1 : index
    %c0_35 = arith.constant 0 : index
    %c0_36 = arith.constant 0 : index
    %30 = vector.load %arg9[%c1, %c0_35, %c0_36] : memref<2x8x32xf32, #tpu.memory_space<vmem>>, vector<1x8x32xf32>
    %31 = vector.shape_cast %30 : vector<1x8x32xf32> to vector<8x32xf32>
    %32 = vector.shape_cast %29#0 : vector<8x32xf32> to vector<1x8x32xf32>
    tpu.vector_store %arg9[%c1, %c0_35, %c0_36], %32 {strides = array<i32>} : memref<2x8x32xf32, #tpu.memory_space<vmem>>, vector<1x8x32xf32>,
    %c1_37 = arith.constant 1 : index
    %c0_38 = arith.constant 0 : index
    %c0_39 = arith.constant 0 : index
    %33 = vector.load %arg10[%c1_37, %c0_38, %c0_39] : memref<2x8x32xf32, #tpu.memory_space<vmem>>, vector<1x8x32xf32>
    %34 = vector.shape_cast %33 : vector<1x8x32xf32> to vector<8x32xf32>
    %35 = vector.shape_cast %29#1 : vector<8x32xf32> to vector<1x8x32xf32>
    tpu.vector_store %arg10[%c1_37, %c0_38, %c0_39], %35 {strides = array<i32>} : memref<2x8x32xf32, #tpu.memory_space<vmem>>, vector<1x8x32xf32>,
    %c0_40 = arith.constant 0 : index
    %c0_41 = arith.constant 0 : index
    %36 = vector.load %arg12[%c0_40, %c0_41] : memref<64x32xf32, #tpu.memory_space<vmem>>, vector<64x32xf32>
    %c0_42 = arith.constant 0 : index
    %c0_43 = arith.constant 0 : index
    %37 = vector.load %arg8[%c0_42, %c0_43] : memref<64x32xf32, #tpu.memory_space<vmem>>, vector<64x32xf32>
    tpu.vector_store %arg8[%c0_42, %c0_43], %36 {strides = array<i32>} : memref<64x32xf32, #tpu.memory_space<vmem>>, vector<64x32xf32>,
    return
  }
  func.func @transform_0(%arg0: i32) -> (i32, i32) {
    %c0_i32 = arith.constant 0 : i32
    %c0_i32_0 = arith.constant 0 : i32
    %c0_i32_1 = arith.constant 0 : i32
    return %c0_i32, %c0_i32_0 : i32, i32
  }
  func.func @transform_1(%arg0: i32) -> (i32, i32) {
    %c0_i32 = arith.constant 0 : i32
    %c0_i32_0 = arith.constant 0 : i32
    %c0_i32_1 = arith.constant 0 : i32
    return %c0_i32, %c0_i32_0 : i32, i32
  }
  func.func @transform_2(%arg0: i32) -> (i32, i32) {
    %c0_i32 = arith.constant 0 : i32
    %c0_i32_0 = arith.constant 0 : i32
    %c0_i32_1 = arith.constant 0 : i32
    return %c0_i32, %c0_i32_0 : i32, i32
  }
  func.func @transform_3(%arg0: i32) -> (i32, i32) {
    %c0_i32 = arith.constant 0 : i32
    %c0_i32_0 = arith.constant 0 : i32
    %c0_i32_1 = arith.constant 0 : i32
    return %c0_i32, %c0_i32_0 : i32, i32
  }
  func.func @transform_4(%arg0: i32) -> (i32, i32) {
    %c0_i32 = arith.constant 0 : i32
    %c0_i32_0 = arith.constant 0 : i32
    %c0_i32_1 = arith.constant 0 : i32
    return %c0_i32, %c0_i32_0 : i32, i32
  }
  func.func @transform_5(%arg0: i32) -> (i32, i32) {
    %c0_i32 = arith.constant 0 : i32
    %c0_i32_0 = arith.constant 0 : i32
    %c0_i32_1 = arith.constant 0 : i32
    return %c0_i32, %c0_i32_0 : i32, i32
  }
  func.func @transform_6(%arg0: i32) -> (i32, i32) {
    %c0_i32 = arith.constant 0 : i32
    %c0_i32_0 = arith.constant 0 : i32
    %c0_i32_1 = arith.constant 0 : i32
    return %c0_i32, %c0_i32_0 : i32, i32
  }
  func.func @transform_7(%arg0: i32) -> (i32, i32) {
    %c0_i32 = arith.constant 0 : i32
    %c0_i32_0 = arith.constant 0 : i32
    %c0_i32_1 = arith.constant 0 : i32
    return %c0_i32, %c0_i32_0 : i32, i32
  }
  func.func @transform_8(%arg0: i32) -> (i32, i32, i32) {
    %c0_i32 = arith.constant 0 : i32
    %c0_i32_0 = arith.constant 0 : i32
    %c0_i32_1 = arith.constant 0 : i32
    %c0_i32_2 = arith.constant 0 : i32
    return %c0_i32, %c0_i32_0, %c0_i32_1 : i32, i32, i32
  }
  func.func @transform_9(%arg0: i32) -> (i32, i32, i32) {
    %c0_i32 = arith.constant 0 : i32
    %c0_i32_0 = arith.constant 0 : i32
    %c0_i32_1 = arith.constant 0 : i32
    %c0_i32_2 = arith.constant 0 : i32
    return %c0_i32, %c0_i32_0, %c0_i32_1 : i32, i32, i32
  }
}

</mosaic_0001>

<bundles_post_ra>
// kernel: tpu_custom_call.1
= control target key start
LH: loop header
LB: loop body
LE: loop exit
PB: predicated region body
PF: predicated region fallthrough
CT: control target
= control target key end

     0   :  { %15 = vsyncpa [#allocation5], 0  ;;  %s1336_s0 = inlined_call_operand.vmem [shape: f32[64,16], index: 0, kind: input, shape index: {}]   ;;  %s1337_s1 = inlined_call_operand.hbm [shape: f32[16,128], index: 1, kind: input, shape index: {}]   ;;  %s1338_s2 = inlined_call_operand.vmem [shape: f32[32,128], index: 2, kind: input, shape index: {}]   ;;  %s1339_s3 = inlined_call_operand.vmem [shape: f32[1,128], index: 3, kind: input, shape index: {}]   ;;  %s1340_s4 = inlined_call_operand.vmem [shape: f32[32,128], index: 4, kind: input, shape index: {}]   ;;  %s1341_s5 = inlined_call_operand.vmem [shape: f32[32,128], index: 5, kind: input, shape index: {}]   ;;  %s1342_s6 = inlined_call_operand.vmem [shape: f32[1,128], index: 6, kind: input, shape index: {}]   ;;  %s1343_s7 = inlined_call_operand.vmem [shape: f32[64,32], index: 7, kind: output, shape index: {0}]   ;;  %s1344_s8 = inlined_call_operand.hbm [shape: f32[2,8,32], index: 8, kind: output, shape index: {1}]   ;;  %s1345_s9 = inlined_call_operand.hbm [shape: f32[2,8,32], index: 9, kind: output, shape index: {2}]  }
   0x1   :  { %16 = vsyncpa [#allocation6], 0 }
   0x2   :  { %17 = vsyncpa [#allocation9], 0  ;;  %s1050_s30 = smov [#allocation4]   ;;  %s930_s13 = scalar_lea.hbm %s1337_s1, 256 }
   0x3   :  { %s25_s10 = sshll.u32 %s1050_s30, 4  ;;  %p931_p0 = scmp.ne.s32.totalorder %s1337_s1, %s930_s13  ;;  %s26_s10 = int_to_ptr.vmem [resolvable:$true] %s25_s10 }
   0x4   :  { %p934_p1 = scmp.lt.u32.totalorder %s930_s13, %s1337_s1 }
   0x6   :  { %p936_p2 = pnand %p934_p1, %p931_p0 }
   0x8   :  { %939 = shalt.err (!%p936_p2)
}
   0x9   :  { %s940_s18 = scalar_lea.vmem %s26_s10, 256  ;;  %p945_p4 = scmp.lt.s32.totalorder %s26_s10, %s26_s10 }
   0xa   :  { %p941_p3 = scmp.ne.s32.totalorder %s26_s10, %s940_s18  ;;  %p946_p5 = scmp.lt.s32.totalorder %s940_s18, %s940_s18 }
   0xc   :  { %p947_p6 = por %p946_p5, %p945_p4 }
   0xe   :  { %p948_p7 = pnand %p947_p6, %p941_p3 }
  0x10   :  { %951 = shalt.err (!%p948_p7)
}
  0x11   :  { %s1051_s19 = smov 128   ;;  %s1052_s20 = smov 8  }
  0x12   :  { %31 = dma.hbm_to_vmem [thread:$0]  %s1337_s1, 256, %s26_s10, [#allocation5], %s1051_s19, %s1051_s19, %s1052_s20  }
  0x13   :  { %1020 = dma.done.wait [#allocation5], 256  }
  0x14   :  { %1021 = vsyncadd [#allocation5], 4294967040  ;;  %v1135_v0 = vld [vmem:[%s1338_s2] sm:$0xff]  ;;  %v1140_v1 = vld [vmem:[%s1338_s2 + $0x8] sm:$0xff]  ;;  %vm66_vm0 = vcmask 130048   ;;  %v1026_v32 = vmov 0.0  }
  0x15   :  { %v1145_v2 = vld [vmem:[%s1338_s2 + $0x10] sm:$0xff]  ;;  %v1150_v3 = vld [vmem:[%s1338_s2 + $0x18] sm:$0xff]  ;;  %v45_v4 = vld [vmem:[#allocation4] sm:$0xff]  ;;  %v1030_v33 = vmov 0.0  }
  0x16   :  { %v46_v5 = vld [vmem:[#allocation4 + $0x8] sm:$0xff]  ;;  %v52_v7 = vld [vmem:[%s1336_s0] sm:$0xff]  ;;  %v54_v11 = vld [vmem:[%s1336_s0 + $0x10] sm:$0xff] }
  0x17   :  { %v819_v6 = vpack.c.bf16 %v46_v5, %v45_v4  ;;  %v56_v8 = vld [vmem:[%s1336_s0 + $0x20] sm:$0xff]  ;;  %765 = vmatprep.mubr.msk.f32.mxu0 %vm66_vm0, %v52_v7  ;;  %v53_v9 = vld [vmem:[%s1336_s0 + $0x8] sm:$0xff]  ;;  %v58_v12 = vld [vmem:[%s1336_s0 + $0x30] sm:$0xff] }
  0x18   :  { %771 = vmatprep.mubr.msk.f32.mxu1 %vm66_vm0, %v56_v8  ;;  %v57_v10 = vld [vmem:[%s1336_s0 + $0x28] sm:$0xff]  ;;  %v55_v13 = vld [vmem:[%s1336_s0 + $0x18] sm:$0xff]  ;;  %v705_v15 = vld [vmem:[%s1339_s3] ss:$0 sm:$0xff] }
  0x19   :  { %820 = vmatprep.subr.bf16.mxu0 %v819_v6  ;;  %843 = vmatprep.subr.bf16.mxu1 %v819_v6  ;;  %v59_v14 = vld [vmem:[%s1336_s0 + $0x38] sm:$0xff]  ;;  %s1187_s0 = smov 0  }
  0x1a   :  { %822 = vmatpush3.bf16.msra.mxu0 %v819_v6  ;;  %844 = vmatpush3.bf16.msra.mxu1 %v819_v6 }
  0x1d   :  { %766 = vmatmul.mubr.msk.f32.vlgmr.msra.gmra.mrb[0].mxu0 %vm66_vm0, %v53_v9  ;;  %772 = vmatmul.mubr.msk.f32.vlgmr.msra.gmra.mrb[0].mxu1 %vm66_vm0, %v57_v10 }
  0x1e   :  { %768 = vmatprep.mubr.msk.f32.mxu0 %vm66_vm0, %v54_v11  ;;  %774 = vmatprep.mubr.msk.f32.mxu1 %vm66_vm0, %v58_v12 }
  0x21   :  { %769 = vmatmul.mubr.msk.f32.gmra.mrb[2].mxu0 %vm66_vm0, %v55_v13  ;;  %775 = vmatmul.mubr.msk.f32.gmra.mrb[2].mxu1 %vm66_vm0, %v59_v14 }
  0xf0   :  { %v767_v16 = vpop.f32.mrb[0].mxu0  ;;  %v773_v17 = vpop.f32.mrb[0].mxu1 }
  0xf1   :  { %v163_v18 = vadd.f32 %v767_v16, %v705_v15  ;;  %v183_v19 = vadd.f32 %v773_v17, %v705_v15  ;;  %v157_v20 = vpop.f32.mrb[1].mxu0  ;;  %v177_v21 = vpop.f32.mrb[1].mxu1 }
  0xf2   :  { %v158_v22 = vadd.f32 %v705_v15, %v157_v20  ;;  %v178_v23 = vadd.f32 %v705_v15, %v177_v21 }
  0xf3   :  { %197 = vst [vmem:[#allocation2 + $0x8] sm:$0xff] %v163_v18  ;;  %201 = vst [vmem:[#allocation2 + $0x28] sm:$0xff] %v183_v19 }
  0xf4   :  { %196 = vst [vmem:[#allocation2] sm:$0xff] %v158_v22  ;;  %200 = vst [vmem:[#allocation2 + $0x20] sm:$0xff] %v178_v23  ;;  %v770_v24 = vpop.f32.mrb[2].mxu0  ;;  %v776_v25 = vpop.f32.mrb[2].mxu1 }
  0xf5   :  { %v173_v26 = vadd.f32 %v770_v24, %v705_v15  ;;  %v193_v27 = vadd.f32 %v776_v25, %v705_v15  ;;  %v167_v28 = vpop.f32.mrb[3].mxu0  ;;  %v187_v29 = vpop.f32.mrb[3].mxu1 }
  0xf6   :  { %v168_v30 = vadd.f32 %v705_v15, %v167_v28  ;;  %v188_v31 = vadd.f32 %v705_v15, %v187_v29 }
  0xf7   :  { %199 = vst [vmem:[#allocation2 + $0x18] sm:$0xff] %v173_v26  ;;  %203 = vst [vmem:[#allocation2 + $0x38] sm:$0xff] %v193_v27 }
  0xf8   :  { %198 = vst [vmem:[#allocation2 + $0x10] sm:$0xff] %v168_v30  ;;  %202 = vst [vmem:[#allocation2 + $0x30] sm:$0xff] %v188_v31 }
  0xf9 LB: > { %v824_v34 = vpack.c.bf16 %v1140_v1, %v1135_v0  ;;  %v1053_v35 = vmov 0.0|0.0   ;;  %s1054_s3 = smov 32   ;;  %v827_v36 = vpack.c.bf16 %v1150_v3, %v1145_v2  ;;  %vm1055_vm1 = vmmov 0   ;;  %s714_s28 = sshll.u32 %s1036_s0, 3  ;;  %s1036_s0 = sphi %s1187_s0, %s209_s0   ;;  %v1032_v33 = vphi %v1030_v33, %v1031_v33   ;;  %v1028_v32 = vphi %v1026_v32, %v1027_v32  }
  0xfa   : > { %823 = vmatprep.subr.bf16.mxu0 %v1053_v35  ;;  %216 = vrot.lane.b32.xlu0 %v1032_v33, %s1054_s3  ;;  %v1056_v37 = vmov 0.0   ;;  %vm218_vm2 = vcmask 261120   ;;  %s213_s29 = scalar_lea.vmem [#allocation2], %s714_s28  ;;  %s1057_s1 = smov 64  }
  0xfb   : > { %825 = vmatpush3.bf16.msra.mxu0 %v824_v34  ;;  %785 = vmatprep.mubr.msk.f32.mxu0 %vm1055_vm1, %v1056_v37  ;;  %s320_s30 = scalar_lea.vmem [#allocation3], %s714_s28  ;;  %s209_s0 = sadd.s32 1, %s1036_s0  }
  0xfc   : > { %826 = vmatprep.subr.bf16.mxu0 %v1053_v35  ;;  %p206_p8 = scmp.ge.s32.totalorder %s209_s0, 8  }
  0xfd   :  { %v333_v57 = vld [vmem:[%s1340_s4] sm:$0xff] (%p206_p8)  ;;  %v334_v58 = vld [vmem:[%s1340_s4 + $0x8] sm:$0xff] (%p206_p8)  ;;  %v1224_v61 = vld [vmem:[%s1341_s5 + $0x10] sm:$0xff] (%p206_p8)  ;;  %s1058_s23 = smov (%p206_p8), 32   ;;  %v1038_v30 = vmov (%p206_p8), 0.0   ;;  %v1042_v31 = vmov (%p206_p8), 0.0  }
  0xfe   :  { %v1214_v59 = vld [vmem:[%s1341_s5] sm:$0xff] (%p206_p8)  ;;  %v1219_v60 = vld [vmem:[%s1341_s5 + $0x8] sm:$0xff] (%p206_p8)  ;;  %v1229_v62 = vld [vmem:[%s1341_s5 + $0x18] sm:$0xff] (%p206_p8)  ;;  %v829_v63 = vpack.c.bf16 (%p206_p8), %v334_v58, %v333_v57  ;;  %s1059_s5 = smov (%p206_p8), 96  }
  0xff   : > { %828 = vmatpush3.bf16.msra.mxu0 %v827_v36  ;;  %v214_v39 = vld [vmem:[%s213_s29] sm:$0xff]  ;;  %v335_v0 = vld [vmem:[%s1340_s4 + $0x10] sm:$0xff] (%p206_p8)  ;;  %v336_v1 = vld [vmem:[%s1340_s4 + $0x18] sm:$0xff] (%p206_p8) }
 0x100   :  { %830 = vmatprep.subr.bf16.mxu0 (%p206_p8), %v829_v63  ;;  %845 = vmatprep.subr.bf16.mxu1 (%p206_p8), %v829_v63  ;;  %v833_v2 = vpack.c.bf16 (%p206_p8), %v336_v1, %v335_v0  ;;  %v717_v13 = vld [vmem:[%s1342_s6] ss:$0 sm:$0xff] (%p206_p8)  ;;  %s1252_s6 = smov (%p206_p8), 0  }
 0x101   :  { %847 = vmatpush3.bf16.msra.mxu1 (%p206_p8), %v829_v63 }
 0x102   :  { %846 = vmatprep.subr.bf16.mxu1 (%p206_p8), %v833_v2 }
 0x105   :  { %848 = vmatpush3.bf16.msra.mxu1 (%p206_p8), %v833_v2 }
 0x16c   : > { %v217_v38 = vpop.permute.xlu0 %216 }
 0x16d   : > { %786 = vmatmul.mubr.msk.f32.vlgmr.msra.gmra.mrb[0].mxu0 %vm218_vm2, %v217_v38 }
 0x16e   :  { %832 = vmatpush3.bf16.msra.mxu0 (%p206_p8), %v829_v63 }
 0x16f   :  { %834 = vmatprep.subr.bf16.mxu0 (%p206_p8), %v833_v2 }
 0x172   :  { %836 = vmatpush3.bf16.msra.mxu0 (%p206_p8), %v833_v2 }
 0x240   : > { %v287_v40 = vpop.f32.mrb[0].mxu0 }
 0x241   : > { %v291_v41 = vadd.f32 %v287_v40, %v214_v39  ;;  %v787_v42 = vpop.f32.mrb[1].mxu0 }
 0x243   : > { %914 = vtanh.f32 %v291_v41  ;;  %v716_v44 = vmul.f32 -1.442695, %v291_v41 }
 0x245   : > { %916 = vpow2.f32 %v716_v44 }
 0x24d   : > { %v915_v43 = vpop.eup %914 }
 0x24e   : > { %301 = vrot.lane.b32.xlu0 %v915_v43, %s1057_s1 }
 0x24f   : > { %v917_v45 = vpop.eup %916 }
 0x250   : > { %v295_v46 = vadd.f32 1.0, %v917_v45 }
 0x252   : > { %918 = vrcp.f32 %v295_v46 }
 0x25c   : > { %v919_v47 = vpop.eup %918 }
 0x25d   : > { %v299_v50 = vmul.f32 %v1028_v32, %v919_v47 }
 0x2c0   : > { %v302_v48 = vpop.permute.xlu0 %301 }
 0x2c1   : > { %v304_v49 = vmul.f32 %v919_v47, %v302_v48 }
 0x2c3   : > { %306 = vrot.lane.b32.xlu1 %v304_v49, %s1054_s3 }
 0x335   : > { %v307_v51 = vpop.permute.xlu1 %306 }
 0x336   : > { %v309_v52 = vadd.f32 %v307_v51, %v299_v50  }
 0x338   : > { %920 = vtanh.f32 %v309_v52  ;;  %v1027_v32 = vmov %v309_v52  }
 0x342   : > { %v921_v53 = vpop.eup %920 }
 0x343   : > { %312 = vrot.lane.b32.xlu1 %v921_v53, %s1057_s1 }
 0x3b5   : > { %v313_v54 = vpop.permute.xlu1 %312 }
 0x3b6   : > { %v315_v55 = vmul.f32 %v919_v47, %v313_v54  }
 0x3b8   : > { %317 = vrot.lane.b32.xlu0 %v315_v55, %s1054_s3  ;;  %v1031_v33 = vmov %v315_v55  }
 0x3bc   :  { %323 = vrot.lane.b32.xlu0 (%p206_p8), %v315_v55, %s1058_s23 }
 0x3c0   :  { %329 = vrot.lane.b32.xlu0 (%p206_p8), %v309_v52, %s1059_s5 }
 0x425   :  { %208 = sbr.rel (!%p206_p8) target bundleno = 249 (0xf9), region = 88 }
 0x42a   : > { %v318_v56 = vpop.permute.xlu0 %317 }
 0x42b   : > { %321 = vst.msk [vmem:[%s320_s30] sm:$0xff] %vm218_vm2, %v318_v56 }
 0x42e   :  { %v324_v11 = vpop.permute.xlu0 %323 }
 0x42f   :  { %327 = vst.msk [vmem:[#allocation7] sm:$0xff] %vm218_vm2, %v324_v11 }
 0x432   :  { %v342_v3 = vld [vmem:[#allocation3] sm:$0xff]  ;;  %v343_v5 = vld [vmem:[#allocation3 + $0x8] sm:$0xff]  ;;  %v344_v7 = vld [vmem:[#allocation3 + $0x10] sm:$0xff]  ;;  %v330_v12 = vpop.permute.xlu0 %329 }
 0x433   :  { %v346_v4 = vld [vmem:[#allocation3 + $0x20] sm:$0xff]  ;;  %796 = vmatprep.mubr.msk.f32.mxu0 %vm218_vm2, %v342_v3  ;;  %v347_v6 = vld [vmem:[#allocation3 + $0x28] sm:$0xff]  ;;  %v348_v8 = vld [vmem:[#allocation3 + $0x30] sm:$0xff]  ;;  %332 = vst.msk [vmem:[#allocation8] sm:$0xff] %vm218_vm2, %v330_v12 }
 0x434   :  { %802 = vmatprep.mubr.msk.f32.mxu1 %vm218_vm2, %v346_v4  ;;  %797 = vmatmul.mubr.msk.f32.vlgmr.msra.gmra.mrb[0].mxu0 %vm218_vm2, %v343_v5  ;;  %v345_v9 = vld [vmem:[#allocation3 + $0x18] sm:$0xff] }
 0x435   :  { %803 = vmatmul.mubr.msk.f32.vlgmr.msra.gmra.mrb[0].mxu1 %vm218_vm2, %v347_v6  ;;  %799 = vmatprep.mubr.msk.f32.mxu0 %vm218_vm2, %v344_v7  ;;  %v349_v10 = vld [vmem:[#allocation3 + $0x38] sm:$0xff] }
 0x436   :  { %805 = vmatprep.mubr.msk.f32.mxu1 %vm218_vm2, %v348_v8 }
 0x438   :  { %800 = vmatmul.mubr.msk.f32.gmra.mrb[2].mxu0 %vm218_vm2, %v345_v9 }
 0x439   :  { %806 = vmatmul.mubr.msk.f32.gmra.mrb[2].mxu1 %vm218_vm2, %v349_v10 }
 0x507   :  { %v798_v14 = vpop.f32.mrb[0].mxu0 }
 0x508   :  { %v804_v15 = vpop.f32.mrb[0].mxu1  ;;  %v452_v16 = vadd.f32 %v798_v14, %v717_v13  ;;  %v446_v18 = vpop.f32.mrb[1].mxu0 }
 0x509   :  { %v472_v17 = vadd.f32 %v804_v15, %v717_v13  ;;  %v466_v19 = vpop.f32.mrb[1].mxu1  ;;  %v447_v20 = vadd.f32 %v717_v13, %v446_v18 }
 0x50a   :  { %v467_v21 = vadd.f32 %v717_v13, %v466_v19  ;;  %486 = vst [vmem:[#allocation2 + $0x8] sm:$0xff] %v452_v16 }
 0x50b   :  { %490 = vst [vmem:[#allocation2 + $0x28] sm:$0xff] %v472_v17  ;;  %485 = vst [vmem:[#allocation2] sm:$0xff] %v447_v20  ;;  %v801_v22 = vpop.f32.mrb[2].mxu0 }
 0x50c   :  { %489 = vst [vmem:[#allocation2 + $0x20] sm:$0xff] %v467_v21  ;;  %v807_v23 = vpop.f32.mrb[2].mxu1  ;;  %v462_v24 = vadd.f32 %v801_v22, %v717_v13  ;;  %v456_v26 = vpop.f32.mrb[3].mxu0 }
 0x50d   :  { %v482_v25 = vadd.f32 %v807_v23, %v717_v13  ;;  %v476_v27 = vpop.f32.mrb[3].mxu1  ;;  %v457_v28 = vadd.f32 %v717_v13, %v456_v26 }
 0x50e   :  { %v477_v29 = vadd.f32 %v717_v13, %v476_v27  ;;  %488 = vst [vmem:[#allocation2 + $0x18] sm:$0xff] %v462_v24 }
 0x50f   :  { %492 = vst [vmem:[#allocation2 + $0x38] sm:$0xff] %v482_v25  ;;  %487 = vst [vmem:[#allocation2 + $0x10] sm:$0xff] %v457_v28 }
 0x510   :  { %491 = vst [vmem:[#allocation2 + $0x30] sm:$0xff] %v477_v29 }
 0x511 LB: > { %v838_v32 = vpack.c.bf16 %v1219_v60, %v1214_v59  ;;  %v1060_v33 = vmov 0.0|0.0   ;;  %s1061_s3 = smov 32   ;;  %v841_v34 = vpack.c.bf16 %v1229_v62, %v1224_v61  ;;  %vm1062_vm3 = vmmov 0   ;;  %s726_s28 = sshll.u32 %s1048_s6, 3  ;;  %s1048_s6 = sphi %s1252_s6, %s498_s6   ;;  %v1044_v31 = vphi %v1042_v31, %v1043_v31   ;;  %v1040_v30 = vphi %v1038_v30, %v1039_v30  }
 0x512   : > { %837 = vmatprep.subr.bf16.mxu0 %v1060_v33  ;;  %505 = vrot.lane.b32.xlu0 %v1044_v31, %s1061_s3  ;;  %v1063_v35 = vmov 0.0   ;;  %s502_s29 = scalar_lea.vmem [#allocation2], %s726_s28  ;;  %s1064_s1 = smov 64  }
 0x513   : > { %839 = vmatpush3.bf16.msra.mxu0 %v838_v32  ;;  %816 = vmatprep.mubr.msk.f32.mxu0 %vm1062_vm3, %v1063_v35  ;;  %s608_s30 = scalar_lea.vmem [#allocation3], %s726_s28  ;;  %s498_s6 = sadd.s32 1, %s1048_s6  }
 0x514   : > { %840 = vmatprep.subr.bf16.mxu0 %v1060_v33  ;;  %p495_p9 = scmp.ge.s32.totalorder %s498_s6, 8  }
 0x515   :  { %s1065_s27 = smov (%p495_p9), [#allocation7]   ;;  %s1066_s0 = smov (%p495_p9), [#allocation8]  }
 0x516   :  { %s645_s4 = sshll.u32 (%p495_p9), %s1065_s27, 4  ;;  %s657_s6 = sshll.u32 (%p495_p9), %s1066_s0, 4  ;;  %s646_s4 = int_to_ptr.vmem [resolvable:$true] %s645_s4  ;;  %s658_s6 = int_to_ptr.vmem [resolvable:$true] %s657_s6 }
 0x517   : > { %842 = vmatpush3.bf16.msra.mxu0 %v841_v34  ;;  %v503_v37 = vld [vmem:[%s502_s29] sm:$0xff]  ;;  %p957_p11 = scmp.lt.s32.totalorder (%p495_p9), %s646_s4, %s646_s4 }
 0x584   : > { %v506_v36 = vpop.permute.xlu0 %505 }
 0x585   : > { %817 = vmatmul.mubr.msk.f32.vlgmr.msra.gmra.mrb[0].mxu0 %vm218_vm2, %v506_v36 }
 0x658   : > { %v575_v38 = vpop.f32.mrb[0].mxu0 }
 0x659   : > { %v579_v39 = vadd.f32 %v575_v38, %v503_v37  ;;  %v818_v40 = vpop.f32.mrb[1].mxu0 }
 0x65b   : > { %922 = vtanh.f32 %v579_v39  ;;  %v728_v42 = vmul.f32 -1.442695, %v579_v39 }
 0x65d   : > { %924 = vpow2.f32 %v728_v42 }
 0x665   : > { %v923_v41 = vpop.eup %922 }
 0x666   : > { %589 = vrot.lane.b32.xlu0 %v923_v41, %s1064_s1 }
 0x667   : > { %v925_v43 = vpop.eup %924 }
 0x668   : > { %v583_v44 = vadd.f32 1.0, %v925_v43 }
 0x66a   : > { %926 = vrcp.f32 %v583_v44 }
 0x674   : > { %v927_v45 = vpop.eup %926 }
 0x675   : > { %v587_v48 = vmul.f32 %v1040_v30, %v927_v45 }
 0x6d8   : > { %v590_v46 = vpop.permute.xlu0 %589 }
 0x6d9   : > { %v592_v47 = vmul.f32 %v927_v45, %v590_v46 }
 0x6db   : > { %594 = vrot.lane.b32.xlu1 %v592_v47, %s1061_s3 }
 0x74d   : > { %v595_v49 = vpop.permute.xlu1 %594 }
 0x74e   : > { %v597_v50 = vadd.f32 %v595_v49, %v587_v48  }
 0x750   : > { %928 = vtanh.f32 %v597_v50  ;;  %v1039_v30 = vmov %v597_v50  }
 0x75a   : > { %v929_v51 = vpop.eup %928 }
 0x75b   : > { %600 = vrot.lane.b32.xlu1 %v929_v51, %s1064_s1 }
 0x7cd   : > { %v601_v52 = vpop.permute.xlu1 %600 }
 0x7ce   : > { %v603_v53 = vmul.f32 %v927_v45, %v601_v52  }
 0x7d0   : > { %605 = vrot.lane.b32.xlu0 %v603_v53, %s1061_s3  ;;  %v1043_v31 = vmov %v603_v53   ;;  %s952_s3 = scalar_lea.vmem (%p495_p9), %s646_s4, 256 }
 0x7d1   :  { %p953_p10 = scmp.ne.s32.totalorder (%p495_p9), %s646_s4, %s952_s3  ;;  %p958_p12 = scmp.lt.s32.totalorder (%p495_p9), %s952_s3, %s952_s3 }
 0x7d3   :  { %p959_p13 = por (%p495_p9), %p958_p12, %p957_p11 }
 0x7d4   :  { %611 = vrot.lane.b32.xlu0 (%p495_p9), %v603_v53, %s1058_s23 }
 0x7d5   :  { %p960_p0 = pnand (%p495_p9), %p959_p13, %p953_p10 }
 0x7d8   :  { %617 = vrot.lane.b32.xlu0 (%p495_p9), %v597_v50, %s1059_s5 }
 0x83d   :  { %497 = sbr.rel (!%p495_p9) target bundleno = 1297 (0x511), region = 99 }
 0x842   : > { %v606_v54 = vpop.permute.xlu0 %605 }
 0x843   : > { %609 = vst.msk [vmem:[%s608_s30] sm:$0xff] %vm218_vm2, %v606_v54 }
 0x846   :  { %v612_v61 = vpop.permute.xlu0 %611 }
 0x847   :  { %615 = vst.msk [vmem:[#allocation7 + $0x8] sm:$0xff] %vm218_vm2, %v612_v61 }
 0x84a   :  { %v622_v55 = vld [vmem:[#allocation3] sm:$0xff]  ;;  %v623_v56 = vld [vmem:[#allocation3 + $0x8] sm:$0xff]  ;;  %v624_v57 = vld [vmem:[#allocation3 + $0x10] sm:$0xff] }
 0x84b   :  { %v625_v58 = vld [vmem:[#allocation3 + $0x18] sm:$0xff]  ;;  %v626_v63 = vld [vmem:[#allocation3 + $0x20] sm:$0xff]  ;;  %v627_v0 = vld [vmem:[#allocation3 + $0x28] sm:$0xff]  ;;  %630 = vst.msk [vmem:[%s1343_s7] sm:$0xff] %vm218_vm2, %v622_v55 }
 0x84c   :  { %631 = vst.msk [vmem:[%s1343_s7 + $0x8] sm:$0xff] %vm218_vm2, %v623_v56  ;;  %632 = vst.msk [vmem:[%s1343_s7 + $0x10] sm:$0xff] %vm218_vm2, %v624_v57  ;;  %v628_v59 = vld [vmem:[#allocation3 + $0x30] sm:$0xff]  ;;  %v629_v60 = vld [vmem:[#allocation3 + $0x38] sm:$0xff] }
 0x84d   :  { %633 = vst.msk [vmem:[%s1343_s7 + $0x18] sm:$0xff] %vm218_vm2, %v625_v58  ;;  %634 = vst.msk [vmem:[%s1343_s7 + $0x20] sm:$0xff] %vm218_vm2, %v626_v63 }
 0x84e   :  { %635 = vst.msk [vmem:[%s1343_s7 + $0x28] sm:$0xff] %vm218_vm2, %v627_v0  ;;  %636 = vst.msk [vmem:[%s1343_s7 + $0x30] sm:$0xff] %vm218_vm2, %v628_v59 }
 0x84f   :  { %637 = vst.msk [vmem:[%s1343_s7 + $0x38] sm:$0xff] %vm218_vm2, %v629_v60 }
 0x850   :  { %963 = shalt.err (!%p960_p0)
}
 0x851   :  { %s964_s7 = scalar_lea.hbm %s1344_s8, 256 }
 0x852   :  { %p965_p1 = scmp.ne.s32.totalorder %s1344_s8, %s964_s7  ;;  %p968_p2 = scmp.lt.u32.totalorder %s964_s7, %s1344_s8 }
 0x854   :  { %p970_p3 = pnand %p968_p2, %p965_p1 }
 0x856   :  { %973 = shalt.err (!%p970_p3)
}
 0x857   :  { %651 = dma.vmem_to_hbm [thread:$0]  %s646_s4, 256, %s1344_s8, [#allocation6], %s1051_s19, %s1051_s19, %s1052_s20   ;;  %v618_v62 = vpop.permute.xlu0 %617 }
 0x858   :  { %621 = vst.msk [vmem:[#allocation8 + $0x8] sm:$0xff] %vm218_vm2, %v618_v62  ;;  %s974_s2 = scalar_lea.vmem %s658_s6, 256  ;;  %p979_p5 = scmp.lt.s32.totalorder %s658_s6, %s658_s6 }
 0x859   :  { %p975_p4 = scmp.ne.s32.totalorder %s658_s6, %s974_s2  ;;  %p980_p6 = scmp.lt.s32.totalorder %s974_s2, %s974_s2 }
 0x85b   :  { %p981_p7 = por %p980_p6, %p979_p5 }
 0x85d   :  { %p982_p8 = pnand %p981_p7, %p975_p4 }
 0x85f   :  { %985 = shalt.err (!%p982_p8)
}
 0x860   :  { %s986_s15 = scalar_lea.hbm %s1345_s9, 256 }
 0x861   :  { %p987_p9 = scmp.ne.s32.totalorder %s1345_s9, %s986_s15  ;;  %p990_p10 = scmp.lt.u32.totalorder %s986_s15, %s1345_s9 }
 0x863   :  { %p992_p11 = pnand %p990_p10, %p987_p9 }
 0x865   :  { %995 = shalt.err (!%p992_p11)
}
 0x866   :  { %663 = dma.vmem_to_hbm [thread:$0]  %s658_s6, 256, %s1345_s9, [#allocation9], %s1051_s19, %s1051_s19, %s1052_s20  }
 0x867   :  { %1022 = dma.done.wait [#allocation6], 256  }
 0x868   :  { %1023 = vsyncadd [#allocation6], 4294967040 }
 0x869   :  { %1024 = dma.done.wait [#allocation9], 256  }
 0x86a   :  { %1025 = vsyncadd [#allocation9], 4294967040 }
 0x86b   :  { %672 = vsyncpa [#allocation5], 1 }
 0x86c   :  { %673 = vsyncpa [#allocation6], 1 }
 0x86d   :  { %674 = vsyncpa [#allocation9], 1 }

</bundles_post_ra>
